<compile_context>
chip_gen: v7x
topology: tpu7x:2x2x1
jax: 0.10.0
libtpu: 0.0.40
codegen_flags: <defaults>
</compile_context>

<pallas_src>
import functools

import jax
import jax.numpy as jnp
from jax.experimental import pallas as pl
from jax.experimental.pallas import tpu as pltpu

LANES = 128
SUBLANES = 8
# (2048, 128) f32 block = 1 MiB -> in+out double-buffered = 4 MiB, safe on all
# generations (v5e 16 MiB scoped default, v7x 64 MiB physical VMEM).
DEFAULT_TILE_ROWS = 2048


def _dropout_kernel(seed_ref, x_ref, o_ref, *, inv_keep, threshold, tile_rows):
    rows, lanes = x_ref.shape

    # Global element index of every slot in this tile (counter for the PRNG).
    row = jax.lax.broadcasted_iota(jnp.int32, (rows, lanes), 0)
    lane = jax.lax.broadcasted_iota(jnp.int32, (rows, lanes), 1)
    base_row = pl.program_id(0) * tile_rows
    idx = ((base_row + row) * lanes + lane).astype(jnp.uint32)

    # Counter-based hash PRNG: seed-mixed murmur3 fmix32 finalizer.
    # Pure 32-bit integer VPU ops; identical bits regardless of tiling.
    seed = seed_ref[0].astype(jnp.uint32)
    h = idx + seed * jnp.uint32(0x9E3779B9)
    h = h ^ (h >> 16)
    h = h * jnp.uint32(0x85EBCA6B)
    h = h ^ (h >> 13)
    h = h * jnp.uint32(0xC2B2AE35)
    h = h ^ (h >> 16)

    # Integer-domain keep decision: P(h < keep * 2^32) == keep.
    keep_mask = h < jnp.uint32(threshold)

    x = x_ref[...]                      # stay in input dtype (bf16-friendly)
    o_ref[...] = jnp.where(keep_mask, x * inv_keep, 0.0).astype(o_ref.dtype)


def pallas_dropout(x, seed, p=0.5):
    """Dropout forward matching the PyTorch module (training mode).

    x:    any-shape array (NCHW for conv activations).
    seed: int32 scalar seed for the in-kernel counter-based PRNG.
    """
    keep = 1.0 - p
    if p <= 0.0:
        return x                        # keep == 1: identity
    if p >= 1.0:
        return jnp.zeros_like(x)        # keep == 0: guard inf/nan scaling

    orig_shape = x.shape
    total = x.size

    # Flatten to a lane-dense [rows, 128] slab; pad only if the size is not
    # already a multiple of one (8, 128) vreg tile.
    rows = pl.cdiv(total, LANES)
    rows_padded = ((rows + SUBLANES - 1) // SUBLANES) * SUBLANES
    padded_total = rows_padded * LANES
    needs_pad = padded_total != total

    x_flat = jnp.ravel(x)
    if needs_pad:
        x_flat = jnp.pad(x_flat, (0, padded_total - total))
    x2d = x_flat.reshape(rows_padded, LANES)

    tile_rows = min(DEFAULT_TILE_ROWS, rows_padded)
    grid = (pl.cdiv(rows_padded, tile_rows),)

    # Exact integer threshold for the keep probability.
    threshold = min(int(round(keep * 2.0 ** 32)), 2 ** 32 - 1)
    inv_keep = 1.0 / keep

    seed_arr = jnp.asarray([seed], dtype=jnp.int32)
    itemsize = jnp.dtype(x.dtype).itemsize

    out2d = pl.pallas_call(
        functools.partial(
            _dropout_kernel,
            inv_keep=inv_keep,
            threshold=threshold,
            tile_rows=tile_rows,
        ),
        out_shape=jax.ShapeDtypeStruct((rows_padded, LANES), x.dtype),
        grid=grid,
        in_specs=[
            pl.BlockSpec(memory_space=pltpu.MemorySpace.SMEM),     # seed scalar
            pl.BlockSpec((tile_rows, LANES), lambda i: (i, 0)),    # input tile
        ],
        out_specs=pl.BlockSpec((tile_rows, LANES), lambda i: (i, 0)),
        compiler_params=pltpu.CompilerParams(
            dimension_semantics=("parallel",),
        ),
        cost_estimate=pl.CostEstimate(
            flops=3 * padded_total,
            transcendentals=0,
            bytes_accessed=2 * padded_total * itemsize,
        ),
    )(seed_arr, x2d)

    if needs_pad:
        return out2d.reshape(-1)[:total].reshape(orig_shape)
    return out2d.reshape(orig_shape)


if __name__ == "__main__":
    key = jax.random.PRNGKey(0)
    # Small NCHW activation, consistent with a CNN feature map.
    x = jax.random.normal(key, (2, 4, 16, 16), dtype=jnp.float32)

    p = 0.5
    out = pallas_dropout(x, seed=0, p=p)
    out = jax.block_until_ready(out)

    # Sanity checks on dropout semantics: every surviving element equals
    # x / keep, the rest are exactly zero.
    keep = 1.0 - p
    surviving = out != 0.0
    assert out.shape == x.shape and out.dtype == x.dtype
    assert jnp.allclose(jnp.where(surviving, out, 0.0),
                        jnp.where(surviving, x / keep, 0.0), atol=1e-5)
    # Expected survival rate ~= keep (loose bound on a 2048-element sample).
    frac = float(jnp.mean(surviving.astype(jnp.float32)))
    assert abs(frac - keep) < 0.1, f"survival fraction {frac} far from keep={keep}"

    print("KERNEL_OK")
</pallas_src>

<mosaic_0001>
module attributes {stable_mosaic.version = 11 : i64} {
  func.func @_dropout_kernel(%arg0: i32, %arg1: memref<1xi32, #tpu.memory_space<smem>>, %arg2: memref<16x128xf32, #tpu.memory_space<vmem>>, %arg3: memref<16x128xf32, #tpu.memory_space<vmem>>) attributes {dimension_semantics = [#tpu.dimension_semantics<parallel>], iteration_bounds = array<i64: 1>, scalar_prefetch = 0 : i64, scratch_operands = 0 : i64, tpu.core_type = #tpu.core_type<tc>, window_params = [{transform_indices = @transform_0, window_bounds = array<i64: 1>}, {transform_indices = @transform_1, window_bounds = array<i64: 16, 128>}, {transform_indices = @transform_2, window_bounds = array<i64: 16, 128>}]} {
    %0 = tpu.iota {dimensions = array<i32: 0>} : vector<16x128xi32>
    %1 = tpu.iota {dimensions = array<i32: 1>} : vector<16x128xi32>
    %c16_i32 = arith.constant 16 : i32
    %2 = arith.muli %arg0, %c16_i32 : i32
    %3 = vector.broadcast %2 : i32 to vector<16x128xi32>
    %4 = arith.addi %3, %0 : vector<16x128xi32>
    %c128_i32 = arith.constant 128 : i32
    %5 = vector.broadcast %c128_i32 : i32 to vector<16x128xi32>
    %6 = arith.muli %4, %5 : vector<16x128xi32>
    %7 = arith.addi %6, %1 : vector<16x128xi32>
    %c0 = arith.constant 0 : index
    %8 = memref.load %arg1[%c0] : memref<1xi32, #tpu.memory_space<smem>>
    %c-1640531527_i32 = arith.constant -1640531527 : i32
    %9 = arith.muli %8, %c-1640531527_i32 : i32
    %10 = vector.broadcast %9 : i32 to vector<16x128xi32>
    %11 = arith.addi %7, %10 : vector<16x128xi32>
    %c16_i32_0 = arith.constant 16 : i32
    %12 = vector.broadcast %c16_i32_0 : i32 to vector<16x128xi32>
    %13 = arith.shrui %11, %12 : vector<16x128xi32>
    %14 = arith.xori %11, %13 : vector<16x128xi32>
    %c-2048144789_i32 = arith.constant -2048144789 : i32
    %15 = vector.broadcast %c-2048144789_i32 : i32 to vector<16x128xi32>
    %16 = arith.muli %14, %15 : vector<16x128xi32>
    %c13_i32 = arith.constant 13 : i32
    %17 = vector.broadcast %c13_i32 : i32 to vector<16x128xi32>
    %18 = arith.shrui %16, %17 : vector<16x128xi32>
    %19 = arith.xori %16, %18 : vector<16x128xi32>
    %c-1028477387_i32 = arith.constant -1028477387 : i32
    %20 = vector.broadcast %c-1028477387_i32 : i32 to vector<16x128xi32>
    %21 = arith.muli %19, %20 : vector<16x128xi32>
    %c16_i32_1 = arith.constant 16 : i32
    %22 = vector.broadcast %c16_i32_1 : i32 to vector<16x128xi32>
    %23 = arith.shrui %21, %22 : vector<16x128xi32>
    %24 = arith.xori %21, %23 : vector<16x128xi32>
    %c-2147483648_i32 = arith.constant -2147483648 : i32
    %25 = vector.broadcast %c-2147483648_i32 : i32 to vector<16x128xi32>
    %26 = arith.cmpi ult, %24, %25 : vector<16x128xi32>
    %c0_2 = arith.constant 0 : index
    %c0_3 = arith.constant 0 : index
    %27 = vector.load %arg2[%c0_2, %c0_3] : memref<16x128xf32, #tpu.memory_space<vmem>>, vector<16x128xf32>
    %cst = arith.constant 2.000000e+00 : f32
    %28 = vector.broadcast %cst : f32 to vector<16x128xf32>
    %29 = arith.mulf %27, %28 : vector<16x128xf32>
    %cst_4 = arith.constant 0.000000e+00 : f32
    %30 = vector.broadcast %cst_4 : f32 to vector<16x128xf32>
    %31 = arith.select %26, %29, %30 : vector<16x128xi1>, vector<16x128xf32>
    %c0_5 = arith.constant 0 : index
    %c0_6 = arith.constant 0 : index
    %32 = vector.load %arg3[%c0_5, %c0_6] : memref<16x128xf32, #tpu.memory_space<vmem>>, vector<16x128xf32>
    tpu.vector_store %arg3[%c0_5, %c0_6], %31 {strides = array<i32>} : memref<16x128xf32, #tpu.memory_space<vmem>>, vector<16x128xf32>,
    return
  }
  func.func @transform_0(%arg0: i32) -> i32 {
    %c0_i32 = arith.constant 0 : i32
    %c0_i32_0 = arith.constant 0 : i32
    return %c0_i32 : i32
  }
  func.func @transform_1(%arg0: i32) -> (i32, i32) {
    %c0_i32 = arith.constant 0 : i32
    %c0_i32_0 = arith.constant 0 : i32
    return %arg0, %c0_i32 : i32, i32
  }
  func.func @transform_2(%arg0: i32) -> (i32, i32) {
    %c0_i32 = arith.constant 0 : i32
    %c0_i32_0 = arith.constant 0 : i32
    return %arg0, %c0_i32 : i32, i32
  }
}

</mosaic_0001>

<bundles_post_ra>
// kernel: tpu_custom_call.1
= control target key start
LH: loop header
LB: loop body
LE: loop exit
PB: predicated region body
PF: predicated region fallthrough
CT: control target
= control target key end

     0   :  { %8 = vsyncpa [#allocation4], 0  ;;  %s192_s0 = inlined_call_operand.<no memory space> [shape: s32[1], index: 0, kind: input, shape index: {}]   ;;  %s193_s1 = inlined_call_operand.hbm [shape: f32[16,128], index: 1, kind: input, shape index: {}]   ;;  %s194_s2 = inlined_call_operand.hbm [shape: f32[16,128], index: 2, kind: output, shape index: {}]  }
   0x1   :  { %9 = vsyncpa [#allocation5], 0  ;;  %s140_s9 = smov [#allocation3]   ;;  %s92_s13 = scalar_lea.hbm %s193_s1, 256 }
   0x2   :  { %s17_s10 = sshll.u32 %s140_s9, 4  ;;  %p93_p0 = scmp.ne.s32.totalorder %s193_s1, %s92_s13  ;;  %s18_s10 = int_to_ptr.vmem [resolvable:$true] %s17_s10 }
   0x3   :  { %p96_p1 = scmp.lt.u32.totalorder %s92_s13, %s193_s1 }
   0x5   :  { %p98_p2 = pnand %p96_p1, %p93_p0 }
   0x7   :  { %101 = shalt.err (!%p98_p2)
}
   0x8   :  { %s102_s18 = scalar_lea.vmem %s18_s10, 256  ;;  %p107_p4 = scmp.lt.s32.totalorder %s18_s10, %s18_s10 }
   0x9   :  { %p103_p3 = scmp.ne.s32.totalorder %s18_s10, %s102_s18  ;;  %p108_p5 = scmp.lt.s32.totalorder %s102_s18, %s102_s18 }
   0xb   :  { %p109_p6 = por %p108_p5, %p107_p4 }
   0xd   :  { %p110_p7 = pnand %p109_p6, %p103_p3 }
   0xf   :  { %113 = shalt.err (!%p110_p7)
}
  0x10   :  { %s141_s19 = smov 128   ;;  %s142_s20 = smov 8  }
  0x11   :  { %23 = dma.hbm_to_vmem [thread:$0]  %s193_s1, 256, %s18_s10, [#allocation4], %s141_s19, %s141_s19, %s142_s20  }
  0x12   :  { %136 = dma.done.wait [#allocation4], 256  }
  0x13   :  { %137 = vsyncadd [#allocation4], 4294967040  ;;  %v27_v0 = vlaneseq  ;;  %s41_s25 = smul.u32 2654435769, %s192_s0  ;;  %v63_v21 = vld [vmem:[#allocation3] sm:$0xff]  ;;  %v64_v25 = vld [vmem:[#allocation3 + $0x8] sm:$0xff] }
  0x14   :  { %v65_v26 = vmul.f32 2.0, %v63_v21  ;;  %v66_v29 = vmul.f32 2.0, %v64_v25  ;;  %s143_s0 = smov [#allocation6]  }
  0x15   :  { %v28_v1 = vshrl.u32 %v27_v0, 7  ;;  %v31_v2 = vand.u32 127, %v27_v0  ;;  %v42_v5 = vstv %s41_s25  ;;  %s76_s1 = sshll.u32 %s143_s0, 4  ;;  %s77_s1 = int_to_ptr.vmem [resolvable:$true] %s76_s1 }
  0x16   :  { %s114_s26 = scalar_lea.vmem %s77_s1, 256  ;;  %p119_p9 = scmp.lt.s32.totalorder %s77_s1, %s77_s1 }
  0x17   :  { %v36_v3 = vmul.u32 128, %v28_v1  ;;  %v29_v4 = vadd.s32 8, %v28_v1  ;;  %p115_p8 = scmp.ne.s32.totalorder %s77_s1, %s114_s26  ;;  %p120_p10 = scmp.lt.s32.totalorder %s114_s26, %s114_s26 }
  0x19   :  { %v38_v6 = vadd.s32 %v36_v3, %v31_v2  ;;  %v37_v7 = vmul.u32 128, %v29_v4  ;;  %p121_p11 = por %p120_p10, %p119_p9 }
  0x1b   :  { %v43_v8 = vadd.s32 %v42_v5, %v38_v6  ;;  %v39_v9 = vadd.s32 %v37_v7, %v31_v2  ;;  %p122_p12 = pnand %p121_p11, %p115_p8 }
  0x1d   :  { %v45_v10 = vshrl.u32 %v43_v8, 16  ;;  %v44_v11 = vadd.s32 %v42_v5, %v39_v9 }
  0x1f   :  { %v47_v12 = vxor.u32 %v45_v10, %v43_v8  ;;  %v46_v13 = vshrl.u32 %v44_v11, 16 }
  0x21   :  { %v49_v14 = vmul.u32 2246822507, %v47_v12  ;;  %v48_v15 = vxor.u32 %v46_v13, %v44_v11 }
  0x23   :  { %v51_v16 = vshrl.u32 %v49_v14, 13  ;;  %v50_v17 = vmul.u32 2246822507, %v48_v15 }
  0x25   :  { %v53_v18 = vxor.u32 %v51_v16, %v49_v14  ;;  %v52_v19 = vshrl.u32 %v50_v17, 13 }
  0x27   :  { %v55_v20 = vmul.u32 3266489909, %v53_v18  ;;  %v54_v22 = vxor.u32 %v52_v19, %v50_v17 }
  0x29   :  { %v57_v23 = vshrl.u32 %v55_v20, 16  ;;  %v56_v24 = vmul.u32 3266489909, %v54_v22 }
  0x2b   :  { %v59_v27 = vxor.u32 %v57_v23, %v55_v20  ;;  %v58_v28 = vshrl.u32 %v56_v24, 16 }
  0x2d   :  { %vm61_vm0 = vcmp.lt.u32.totalorder %v59_v27, 2147483648  ;;  %v60_v30 = vxor.u32 %v58_v28, %v56_v24 }
  0x2e   :  { %v67_v31 = vsel %vm61_vm0, %v65_v26, 0.0 }
  0x2f   :  { %69 = vst [vmem:[#allocation6] sm:$0xff] %v67_v31  ;;  %vm62_vm1 = vcmp.lt.u32.totalorder %v60_v30, 2147483648 }
  0x30   :  { %v68_v32 = vsel %vm62_vm1, %v66_v29, 0.0 }
  0x31   :  { %70 = vst [vmem:[#allocation6 + $0x8] sm:$0xff] %v68_v32 }
  0x32   :  { %125 = shalt.err (!%p122_p12)
}
  0x33   :  { %s126_s29 = scalar_lea.hbm %s194_s2, 256 }
  0x34   :  { %p127_p13 = scmp.ne.s32.totalorder %s194_s2, %s126_s29  ;;  %p130_p0 = scmp.lt.u32.totalorder %s126_s29, %s194_s2 }
  0x36   :  { %p132_p1 = pnand %p130_p0, %p127_p13 }
  0x38   :  { %135 = shalt.err (!%p132_p1)
}
  0x39   :  { %82 = dma.vmem_to_hbm [thread:$0]  %s77_s1, 256, %s194_s2, [#allocation5], %s141_s19, %s141_s19, %s142_s20  }
  0x3a   :  { %138 = dma.done.wait [#allocation5], 256  }
  0x3b   :  { %139 = vsyncadd [#allocation5], 4294967040 }
  0x3c   :  { %86 = vsyncpa [#allocation4], 1 }
  0x3d   :  { %87 = vsyncpa [#allocation5], 1 }

</bundles_post_ra>
